<compile_context>
chip_gen: v6e
topology: v6e:2x2x1
jax: 0.10.0
libtpu: 0.0.40
codegen_flags: <defaults>
</compile_context>

<pallas_src>
import functools

import jax
import jax.numpy as jnp
from jax import lax
from jax.experimental import pallas as pl
from jax.experimental.pallas import tpu as pltpu


def _cdiv(a: int, b: int) -> int:
    return -(-a // b)


def _shift_weights(pool_size: int, H: int, W: int):
    """Per-position tap weights for AvgPool2d(count_include_pad=False)(x) - x.

    Returns (weights, offsets):
      weights : (pool_size**2, H*W) f32; tap (dy,dx) weight at flat position
                p = h*W + w is  valid(h+dy, w+dx) / count(h, w), with the
                centre tap reduced by 1.0 so the subtraction of x is folded in.
      offsets : matching flattened index offsets dy*W + dx (static ints).
    """
    pad = pool_size // 2
    hh = jnp.arange(H)
    ww = jnp.arange(W)
    cnt_h = jnp.minimum(hh + pad, H - 1) - jnp.maximum(hh - pad, 0) + 1  # (H,)
    cnt_w = jnp.minimum(ww + pad, W - 1) - jnp.maximum(ww - pad, 0) + 1  # (W,)
    recip = 1.0 / (cnt_h[:, None] * cnt_w[None, :]).astype(jnp.float32)  # (H, W)

    planes, offsets = [], []
    for dy in range(-pad, pad + 1):
        vh = ((hh + dy) >= 0) & ((hh + dy) < H)                          # (H,)
        for dx in range(-pad, pad + 1):
            vw = ((ww + dx) >= 0) & ((ww + dx) < W)                      # (W,)
            wgt = jnp.where(vh[:, None] & vw[None, :], recip, 0.0)
            if dy == 0 and dx == 0:
                wgt = wgt - 1.0          # fold "avg - x" into the centre tap
            planes.append(wgt.reshape(H * W))
            offsets.append(dy * W + dx)
    return jnp.stack(planes, axis=0).astype(jnp.float32), tuple(offsets)


def _pool_kernel(x_ref, w_ref, o_ref, *, hw: int, offsets):
    """x_ref: (TC, HW), w_ref: (K, HW) resident, o_ref: (TC, HW).

    out = sum_k  w_k * roll(x, -offset_k)   (rolls on XLU, mul/add on VPU).
    """
    x = x_ref[...].astype(jnp.float32)                     # (TC, HW)
    acc = None
    for idx, off in enumerate(offsets):
        shifted = x if off == 0 else pltpu.roll(x, (-off) % hw, axis=1)
        term = shifted * w_ref[pl.ds(idx, 1), :]           # (TC,HW) * (1,HW)
        acc = term if acc is None else acc + term
    o_ref[...] = acc.astype(o_ref.dtype)


def _choose_tc(nc: int, row_bytes: int, block_budget_bytes: int,
               *, min_steps: int = 8) -> int:
    """Channel-block size: as big as the VMEM budget allows, but keep at least
    ~min_steps grid steps for pipelining / v7x dual-core sharding, and keep
    the sublane (second-minor) block dim a multiple of 8 (or the full array)."""
    cap = max(1, block_budget_bytes // max(1, row_bytes))
    tc = max(1, min(cap, _cdiv(nc, min_steps)))
    if tc >= 8:
        tc -= tc % 8                   # sublane-aligned block
    elif tc < nc:
        tc = min(nc, 8)                # at least one full sublane group
    return min(tc, nc)


@functools.partial(jax.jit, static_argnames=("pool_size",))
def pooling_forward(x: jax.Array, pool_size: int = 3) -> jax.Array:
    """x: (N, C, H, W) -> AvgPool2d(pool, 1, pool//2, count_include_pad=False)(x) - x."""
    # PyTorch AvgPool2d(stride=1, padding=pool//2) preserves spatial shape only
    # for odd pool_size (PoolFormer uses 3).
    assert pool_size % 2 == 1, "only odd pool_size is supported (shape-preserving)"

    N, C, H, W = x.shape
    nc, hw = N * C, H * W
    xf = x.reshape(nc, hw)                       # lane-dense layout, free reshape

    wts, offsets = _shift_weights(pool_size, H, W)   # (K, HW) constants

    # Generation-aware VMEM budget (v7x: 64 MiB, v5e/v6e: 128 MiB).
    try:
        vmem_cap = int(pltpu.get_tpu_info().vmem_capacity_bytes)
    except Exception:
        vmem_cap = 64 * 2**20
    vmem_limit = min(int(0.75 * vmem_cap), 64 * 2**20)
    # in/out double-buffers = 4x block; leave room for compiler temporaries.
    block_budget = min(4 * 2**20, vmem_limit // 8)

    itemsize = jnp.dtype(x.dtype).itemsize
    tc = _choose_tc(nc, hw * itemsize, block_budget)
    grid = _cdiv(nc, tc)                         # non-divisor blocks allowed

    kernel = functools.partial(_pool_kernel, hw=hw, offsets=offsets)

    out = pl.pallas_call(
        kernel,
        out_shape=jax.ShapeDtypeStruct((nc, hw), x.dtype),
        grid_spec=pltpu.PrefetchScalarGridSpec(
            num_scalar_prefetch=0,
            grid=(grid,),
            in_specs=[
                pl.BlockSpec((tc, hw), lambda i: (i, 0)),
                pl.BlockSpec(wts.shape, lambda i: (0, 0)),   # VMEM-resident
            ],
            out_specs=pl.BlockSpec((tc, hw), lambda i: (i, 0)),
        ),
        compiler_params=pltpu.CompilerParams(
            dimension_semantics=("parallel",),
            vmem_limit_bytes=vmem_limit,
        ),
    )(xf, wts)

    return out.reshape(N, C, H, W)


def _reference(x: jax.Array, pool_size: int = 3) -> jax.Array:
    """Plain-JAX reference for AvgPool2d(count_include_pad=False)(x) - x."""
    pad = pool_size // 2
    N, C, H, W = x.shape
    xp = jnp.pad(x, ((0, 0), (0, 0), (pad, pad), (pad, pad)))
    ones = jnp.pad(jnp.ones((N, C, H, W), x.dtype),
                   ((0, 0), (0, 0), (pad, pad), (pad, pad)))
    s = jnp.zeros((N, C, H, W), x.dtype)
    c = jnp.zeros((N, C, H, W), x.dtype)
    for dy in range(pool_size):
        for dx in range(pool_size):
            s = s + lax.dynamic_slice(xp, (0, 0, dy, dx), (N, C, H, W))
            c = c + lax.dynamic_slice(ones, (0, 0, dy, dx), (N, C, H, W))
    return s / c - x


if __name__ == "__main__":
    key = jax.random.PRNGKey(0)
    x = jax.random.normal(key, (2, 4, 16, 16), dtype=jnp.float32)

    out = pooling_forward(x, pool_size=3)
    out = jax.block_until_ready(out)

    ref = _reference(x, pool_size=3)
    assert out.shape == x.shape and out.dtype == x.dtype
    assert float(jnp.max(jnp.abs(out - ref))) < 1e-5

    print("KERNEL_OK")
</pallas_src>

<mosaic_0001>
module attributes {stable_mosaic.version = 11 : i64} {
  func.func @_pool_kernel(%arg0: i32, %arg1: memref<8x256xf32, #tpu.memory_space<vmem>>, %arg2: memref<9x256xf32, #tpu.memory_space<vmem>>, %arg3: memref<8x256xf32, #tpu.memory_space<vmem>>) attributes {dimension_semantics = [#tpu.dimension_semantics<parallel>], iteration_bounds = array<i64: 1>, scalar_prefetch = 0 : i64, scratch_operands = 0 : i64, tpu.core_type = #tpu.core_type<tc>, window_params = [{transform_indices = @transform_0, window_bounds = array<i64: 8, 256>}, {pipeline_mode = #tpu.pipeline_mode<synchronous>, transform_indices = @transform_1, window_bounds = array<i64: 9, 256>}, {transform_indices = @transform_2, window_bounds = array<i64: 8, 256>}]} {
    %c0 = arith.constant 0 : index
    %c0_0 = arith.constant 0 : index
    %0 = vector.load %arg1[%c0, %c0_0] : memref<8x256xf32, #tpu.memory_space<vmem>>, vector<8x256xf32>
    %c17_i32 = arith.constant 17 : i32
    %1 = tpu.dynamic_rotate %0 by %c17_i32 dim 1 : vector<8x256xf32>, i32 -> vector<8x256xf32>
    %c0_1 = arith.constant 0 : index
    %c0_2 = arith.constant 0 : index
    %2 = vector.load %arg2[%c0_1, %c0_2] : memref<9x256xf32, #tpu.memory_space<vmem>>, vector<1x256xf32>
    %3 = vector.broadcast %2 : vector<1x256xf32> to vector<8x256xf32>
    %4 = arith.mulf %1, %3 : vector<8x256xf32>
    %c16_i32 = arith.constant 16 : i32
    %5 = tpu.dynamic_rotate %0 by %c16_i32 dim 1 : vector<8x256xf32>, i32 -> vector<8x256xf32>
    %c1 = arith.constant 1 : index
    %c0_3 = arith.constant 0 : index
    %6 = vector.load %arg2[%c1, %c0_3] : memref<9x256xf32, #tpu.memory_space<vmem>>, vector<1x256xf32>
    %7 = vector.broadcast %6 : vector<1x256xf32> to vector<8x256xf32>
    %8 = arith.mulf %5, %7 : vector<8x256xf32>
    %9 = arith.addf %4, %8 : vector<8x256xf32>
    %c15_i32 = arith.constant 15 : i32
    %10 = tpu.dynamic_rotate %0 by %c15_i32 dim 1 : vector<8x256xf32>, i32 -> vector<8x256xf32>
    %c2 = arith.constant 2 : index
    %c0_4 = arith.constant 0 : index
    %11 = vector.load %arg2[%c2, %c0_4] : memref<9x256xf32, #tpu.memory_space<vmem>>, vector<1x256xf32>
    %12 = vector.broadcast %11 : vector<1x256xf32> to vector<8x256xf32>
    %13 = arith.mulf %10, %12 : vector<8x256xf32>
    %14 = arith.addf %9, %13 : vector<8x256xf32>
    %c1_i32 = arith.constant 1 : i32
    %15 = tpu.dynamic_rotate %0 by %c1_i32 dim 1 : vector<8x256xf32>, i32 -> vector<8x256xf32>
    %c3 = arith.constant 3 : index
    %c0_5 = arith.constant 0 : index
    %16 = vector.load %arg2[%c3, %c0_5] : memref<9x256xf32, #tpu.memory_space<vmem>>, vector<1x256xf32>
    %17 = vector.broadcast %16 : vector<1x256xf32> to vector<8x256xf32>
    %18 = arith.mulf %15, %17 : vector<8x256xf32>
    %19 = arith.addf %14, %18 : vector<8x256xf32>
    %c4 = arith.constant 4 : index
    %c0_6 = arith.constant 0 : index
    %20 = vector.load %arg2[%c4, %c0_6] : memref<9x256xf32, #tpu.memory_space<vmem>>, vector<1x256xf32>
    %21 = vector.broadcast %20 : vector<1x256xf32> to vector<8x256xf32>
    %22 = arith.mulf %0, %21 : vector<8x256xf32>
    %23 = arith.addf %19, %22 : vector<8x256xf32>
    %c255_i32 = arith.constant 255 : i32
    %24 = tpu.dynamic_rotate %0 by %c255_i32 dim 1 : vector<8x256xf32>, i32 -> vector<8x256xf32>
    %c5 = arith.constant 5 : index
    %c0_7 = arith.constant 0 : index
    %25 = vector.load %arg2[%c5, %c0_7] : memref<9x256xf32, #tpu.memory_space<vmem>>, vector<1x256xf32>
    %26 = vector.broadcast %25 : vector<1x256xf32> to vector<8x256xf32>
    %27 = arith.mulf %24, %26 : vector<8x256xf32>
    %28 = arith.addf %23, %27 : vector<8x256xf32>
    %c241_i32 = arith.constant 241 : i32
    %29 = tpu.dynamic_rotate %0 by %c241_i32 dim 1 : vector<8x256xf32>, i32 -> vector<8x256xf32>
    %c6 = arith.constant 6 : index
    %c0_8 = arith.constant 0 : index
    %30 = vector.load %arg2[%c6, %c0_8] : memref<9x256xf32, #tpu.memory_space<vmem>>, vector<1x256xf32>
    %31 = vector.broadcast %30 : vector<1x256xf32> to vector<8x256xf32>
    %32 = arith.mulf %29, %31 : vector<8x256xf32>
    %33 = arith.addf %28, %32 : vector<8x256xf32>
    %c240_i32 = arith.constant 240 : i32
    %34 = tpu.dynamic_rotate %0 by %c240_i32 dim 1 : vector<8x256xf32>, i32 -> vector<8x256xf32>
    %c7 = arith.constant 7 : index
    %c0_9 = arith.constant 0 : index
    %35 = vector.load %arg2[%c7, %c0_9] : memref<9x256xf32, #tpu.memory_space<vmem>>, vector<1x256xf32>
    %36 = vector.broadcast %35 : vector<1x256xf32> to vector<8x256xf32>
    %37 = arith.mulf %34, %36 : vector<8x256xf32>
    %38 = arith.addf %33, %37 : vector<8x256xf32>
    %c239_i32 = arith.constant 239 : i32
    %39 = tpu.dynamic_rotate %0 by %c239_i32 dim 1 : vector<8x256xf32>, i32 -> vector<8x256xf32>
    %c8 = arith.constant 8 : index
    %c0_10 = arith.constant 0 : index
    %40 = vector.load %arg2[%c8, %c0_10] : memref<9x256xf32, #tpu.memory_space<vmem>>, vector<1x256xf32>
    %41 = vector.broadcast %40 : vector<1x256xf32> to vector<8x256xf32>
    %42 = arith.mulf %39, %41 : vector<8x256xf32>
    %43 = arith.addf %38, %42 : vector<8x256xf32>
    %c0_11 = arith.constant 0 : index
    %c0_12 = arith.constant 0 : index
    %44 = vector.load %arg3[%c0_11, %c0_12] : memref<8x256xf32, #tpu.memory_space<vmem>>, vector<8x256xf32>
    tpu.vector_store %arg3[%c0_11, %c0_12], %43 {strides = array<i32>} : memref<8x256xf32, #tpu.memory_space<vmem>>, vector<8x256xf32>,
    return
  }
  func.func @transform_0(%arg0: i32) -> (i32, i32) {
    %c0_i32 = arith.constant 0 : i32
    %c0_i32_0 = arith.constant 0 : i32
    return %arg0, %c0_i32 : i32, i32
  }
  func.func @transform_1(%arg0: i32) -> (i32, i32) {
    %c0_i32 = arith.constant 0 : i32
    %c0_i32_0 = arith.constant 0 : i32
    %c0_i32_1 = arith.constant 0 : i32
    return %c0_i32, %c0_i32_0 : i32, i32
  }
  func.func @transform_2(%arg0: i32) -> (i32, i32) {
    %c0_i32 = arith.constant 0 : i32
    %c0_i32_0 = arith.constant 0 : i32
    return %arg0, %c0_i32 : i32, i32
  }
}

</mosaic_0001>

<bundles_post_ra>
// kernel: pooling_forward.1
= control target key start
LH: loop header
LB: loop body
LE: loop exit
PB: predicated region body
PF: predicated region fallthrough
CT: control target
= control target key end

     0   :  { %s243_s11 = smov 16   ;;  %s244_s12 = smov 17   ;;  %v17_v2 = vlaneseq  ;;  %s367_s0 = inlined_call_operand.vmem [shape: f32[8,256], index: 0, kind: input, shape index: {}]   ;;  %s368_s1 = inlined_call_operand.vmem [shape: f32[9,256], index: 1, kind: input, shape index: {}]   ;;  %s369_s2 = inlined_call_operand.vmem [shape: f32[8,256], index: 2, kind: output, shape index: {}]  }
   0x1   :  { %v269_v0 = vld [vmem:[%s367_s0] sm:$0xff]  ;;  %v276_v1 = vld [vmem:[%s367_s0 + $0x8] sm:$0xff]  ;;  %s245_s15 = smov 15   ;;  %s246_s16 = smov 1  }
   0x2   :  { %36 = vrot.lane.b32.xlu1 %v269_v0, %s243_s11  ;;  %13 = vrot.lane.b32.xlu0 %v269_v0, %s244_s12  ;;  %s247_s17 = smov 127   ;;  %s248_s0 = smov 113   ;;  %v25_v3 = vshrl.u32 %v17_v2, 7  ;;  %v292_v6 = vand.u32 127, %v17_v2 }
   0x3   :  { %s249_s18 = smov 112   ;;  %s250_s19 = smov 111   ;;  %v227_v9 = vld [vmem:[%s368_s1 + $0x1] ss:$8 sm:$0x3] }
   0x4   :  { %v294_v7 = vsub.s32 0, %v25_v3  ;;  %v296_v8 = vsub.s32 1, %v25_v3  ;;  %v22_v10 = vld [vmem:[%s368_s1] ss:$8 sm:$0x3]  ;;  %vm40_vm0 = vcmp.lt.s32.totalorder %v292_v6, 16 }
   0x5   :  { %vm19_vm1 = vcmp.lt.s32.totalorder %v292_v6, 17  ;;  %vm64_vm2 = vcmp.lt.s32.totalorder %v292_v6, 15  ;;  %v228_v13 = vld [vmem:[%s368_s1 + $0x2] ss:$8 sm:$0x3]  ;;  %vm88_vm3 = vcmp.lt.s32.totalorder %v292_v6, 1 }
   0x6   :  { %38 = vrot.lane.b32.xlu1 %v276_v1, %s243_s11  ;;  %15 = vrot.lane.b32.xlu0 %v276_v1, %s244_s12  ;;  %v49_v14 = vrot.slane %v227_v9, %v294_v7  ;;  %v53_v15 = vrot.slane %v227_v9, %v296_v8  ;;  %v27_v16 = vrot.slane %v22_v10, %v294_v7  ;;  %v229_v18 = vld [vmem:[%s368_s1 + $0x3] ss:$8 sm:$0x3]  ;;  %v230_v35 = vld [vmem:[%s368_s1 + $0x4] ss:$8 sm:$0x3] }
   0x7   :  { %v31_v17 = vrot.slane %v22_v10, %v296_v8  ;;  %v73_v24 = vrot.slane %v228_v13, %v294_v7  ;;  %v77_v25 = vrot.slane %v228_v13, %v296_v8  ;;  %v97_v29 = vrot.slane %v229_v18, %v294_v7  ;;  %v231_v48 = vld [vmem:[%s368_s1 + $0x5] ss:$8 sm:$0x3]  ;;  %v232_v55 = vld [vmem:[%s368_s1 + $0x6] ss:$8 sm:$0x3] }
   0x8   :  { %v101_v30 = vrot.slane %v229_v18, %v296_v8  ;;  %v114_v42 = vrot.slane %v230_v35, %v294_v7  ;;  %v118_v43 = vrot.slane %v230_v35, %v296_v8  ;;  %vm129_vm4 = vcmp.lt.s32.totalorder %v292_v6, 127  ;;  %v233_v60 = vld [vmem:[%s368_s1 + $0x7] ss:$8 sm:$0x3] }
   0x9   :  { %v138_v53 = vrot.slane %v231_v48, %v294_v7  ;;  %v142_v54 = vrot.slane %v231_v48, %v296_v8  ;;  %vm153_vm5 = vcmp.lt.s32.totalorder %v292_v6, 113  ;;  %v162_v2 = vrot.slane %v232_v55, %v294_v7 }
   0xa   :  { %62 = vrot.lane.b32.xlu1 %v276_v1, %s245_s15  ;;  %60 = vrot.lane.b32.xlu0 %v269_v0, %s245_s15  ;;  %v122_v58 = vmul.f32 %v118_v43, %v276_v1  ;;  %v121_v59 = vmul.f32 %v114_v42, %v269_v0  ;;  %v166_v3 = vrot.slane %v232_v55, %v296_v8  ;;  %vm177_vm6 = vcmp.lt.s32.totalorder %v292_v6, 112 }
   0xb   :  { %vm201_vm7 = vcmp.lt.s32.totalorder %v292_v6, 111 }
   0xe   :  { %86 = vrot.lane.b32.xlu1 %v276_v1, %s246_s16  ;;  %84 = vrot.lane.b32.xlu0 %v269_v0, %s246_s16 }
  0x12   :  { %127 = vrot.lane.b32.xlu1 %v276_v1, %s247_s17  ;;  %125 = vrot.lane.b32.xlu0 %v269_v0, %s247_s17 }
  0x16   :  { %151 = vrot.lane.b32.xlu1 %v276_v1, %s248_s0  ;;  %149 = vrot.lane.b32.xlu0 %v269_v0, %s248_s0 }
  0x1a   :  { %175 = vrot.lane.b32.xlu1 %v276_v1, %s249_s18  ;;  %173 = vrot.lane.b32.xlu0 %v269_v0, %s249_s18 }
  0x1e   :  { %199 = vrot.lane.b32.xlu1 %v276_v1, %s250_s19  ;;  %197 = vrot.lane.b32.xlu0 %v269_v0, %s250_s19  ;;  %v186_v1 = vrot.slane %v233_v60, %v294_v7  ;;  %v190_v0 = vrot.slane %v233_v60, %v296_v8 }
  0x74   :  { %v37_v4 = vpop.permute.xlu1 %36  ;;  %v14_v5 = vpop.permute.xlu0 %13 }
  0x78   :  { %v39_v11 = vpop.permute.xlu1 %38  ;;  %v16_v12 = vpop.permute.xlu0 %15 }
  0x79   :  { %v41_v19 = vsel %vm40_vm0, %v37_v4, %v39_v11  ;;  %v42_v20 = vsel %vm40_vm0, %v39_v11, %v37_v4  ;;  %v20_v21 = vsel %vm19_vm1, %v14_v5, %v16_v12  ;;  %v21_v22 = vsel %vm19_vm1, %v16_v12, %v14_v5 }
  0x7a   :  { %v56_v31 = vmul.f32 %v49_v14, %v42_v20  ;;  %v57_v32 = vmul.f32 %v53_v15, %v41_v19  ;;  %v34_v33 = vmul.f32 %v27_v16, %v21_v22  ;;  %v35_v34 = vmul.f32 %v31_v17, %v20_v21  ;;  %v234_v14 = vld [vmem:[%s368_s1 + $0x10] ss:$8 sm:$0x3] }
  0x7b   :  { %v210_v21 = vrot.slane %v234_v14, %v294_v7  ;;  %v214_v22 = vrot.slane %v234_v14, %v296_v8 }
  0x7c   :  { %v63_v23 = vpop.permute.xlu1 %62  ;;  %v61_v26 = vpop.permute.xlu0 %60  ;;  %v58_v44 = vadd.f32 %v56_v31, %v34_v33  ;;  %v59_v45 = vadd.f32 %v57_v32, %v35_v34 }
  0x7d   :  { %v65_v27 = vsel %vm64_vm2, %v61_v26, %v63_v23  ;;  %v66_v28 = vsel %vm64_vm2, %v63_v23, %v61_v26 }
  0x7e   :  { %v80_v36 = vmul.f32 %v73_v24, %v66_v28  ;;  %v81_v37 = vmul.f32 %v77_v25, %v65_v27 }
  0x80   :  { %v87_v38 = vpop.permute.xlu1 %86  ;;  %v85_v39 = vpop.permute.xlu0 %84  ;;  %v82_v49 = vadd.f32 %v80_v36, %v58_v44  ;;  %v83_v50 = vadd.f32 %v81_v37, %v59_v45 }
  0x81   :  { %v89_v40 = vsel %vm88_vm3, %v85_v39, %v87_v38  ;;  %v90_v41 = vsel %vm88_vm3, %v87_v38, %v85_v39 }
  0x82   :  { %v104_v46 = vmul.f32 %v97_v29, %v90_v41  ;;  %v105_v47 = vmul.f32 %v101_v30, %v89_v40 }
  0x84   :  { %v128_v51 = vpop.permute.xlu1 %127  ;;  %v126_v52 = vpop.permute.xlu0 %125  ;;  %v106_v56 = vadd.f32 %v104_v46, %v82_v49  ;;  %v107_v57 = vadd.f32 %v105_v47, %v83_v50 }
  0x85   :  { %v130_v61 = vsel %vm129_vm4, %v126_v52, %v128_v51  ;;  %v131_v62 = vsel %vm129_vm4, %v128_v51, %v126_v52 }
  0x86   :  { %v124_v10 = vadd.f32 %v122_v58, %v107_v57  ;;  %v123_v11 = vadd.f32 %v121_v59, %v106_v56  ;;  %v145_v12 = vmul.f32 %v138_v53, %v130_v61  ;;  %v146_v13 = vmul.f32 %v142_v54, %v131_v62 }
  0x88   :  { %v152_v63 = vpop.permute.xlu1 %151  ;;  %v150_v4 = vpop.permute.xlu0 %149  ;;  %v147_v23 = vadd.f32 %v145_v12, %v123_v11  ;;  %v148_v24 = vadd.f32 %v146_v13, %v124_v10 }
  0x89   :  { %v154_v5 = vsel %vm153_vm5, %v150_v4, %v152_v63  ;;  %v155_v9 = vsel %vm153_vm5, %v152_v63, %v150_v4 }
  0x8a   :  { %v169_v15 = vmul.f32 %v162_v2, %v154_v5  ;;  %v170_v16 = vmul.f32 %v166_v3, %v155_v9 }
  0x8c   :  { %v176_v17 = vpop.permute.xlu1 %175  ;;  %v174_v18 = vpop.permute.xlu0 %173  ;;  %v171_v27 = vadd.f32 %v169_v15, %v147_v23  ;;  %v172_v28 = vadd.f32 %v170_v16, %v148_v24 }
  0x8d   :  { %v178_v19 = vsel %vm177_vm6, %v174_v18, %v176_v17  ;;  %v179_v20 = vsel %vm177_vm6, %v176_v17, %v174_v18 }
  0x8e   :  { %v193_v25 = vmul.f32 %v186_v1, %v178_v19  ;;  %v194_v26 = vmul.f32 %v190_v0, %v179_v20 }
  0x90   :  { %v200_v29 = vpop.permute.xlu1 %199  ;;  %v198_v30 = vpop.permute.xlu0 %197  ;;  %v195_v33 = vadd.f32 %v193_v25, %v171_v27  ;;  %v196_v34 = vadd.f32 %v194_v26, %v172_v28 }
  0x91   :  { %v202_v31 = vsel %vm201_vm7, %v198_v30, %v200_v29  ;;  %v203_v32 = vsel %vm201_vm7, %v200_v29, %v198_v30 }
  0x92   :  { %v217_v35 = vmul.f32 %v210_v21, %v202_v31  ;;  %v218_v36 = vmul.f32 %v214_v22, %v203_v32 }
  0x94   :  { %v219_v6 = vadd.f32 %v217_v35, %v195_v33  ;;  %v220_v37 = vadd.f32 %v218_v36, %v196_v34 }
  0x96   :  { %221 = vst [vmem:[%s369_s2] sm:$0xff] %v219_v6  ;;  %222 = vst [vmem:[%s369_s2 + $0x8] sm:$0xff] %v220_v37 }

</bundles_post_ra>
